<compile_context>
chip_gen: v7x
topology: tpu7x:2x2x1
jax: 0.10.0
libtpu: 0.0.40
codegen_flags: <defaults>
</compile_context>

<pallas_src>
import functools

import numpy as np
import jax
import jax.numpy as jnp
from jax import lax
from jax.experimental import pallas as pl
from jax.experimental.pallas import tpu as pltpu


@functools.lru_cache(maxsize=None)
def _make_scatter_call(db_dim, db_size, n_writes, dtype_name):
    """Builds the pallas_call that scatters `n_writes` gathered columns into db."""
    dtype = jnp.dtype(dtype_name)

    def kernel(tgt_ref, cols_ref, db_in_ref, db_out_ref, db_vmem, sem):
        # Single HBM->VMEM fetch of the db (db_in_ref aliases db_out_ref, so this
        # is the only full-db read; there is no separate blocked init copy).
        cp_in = pltpu.make_async_copy(db_in_ref, db_vmem, sem)
        cp_in.start()
        cp_in.wait()

        lane_ids = lax.broadcasted_iota(jnp.int32, (db_dim, db_size), 1)
        cols = cols_ref[...]          # (db_dim, n_writes): one gathered column per write
        db = db_vmem[...]

        # Fully-unrolled serial scatter (n_writes is a small compile-time const):
        # later writes overwrite earlier ones (last-write-wins, matches the
        # PyTorch/numpy advanced-assignment reference); tgt == -1 (padding or a
        # skipped batch element) never matches the iota -> no-op.
        for k in range(n_writes):
            t = tgt_ref[k]
            db = jnp.where(lane_ids == t, cols[:, k:k + 1], db)

        db_vmem[...] = db

        # Write the updated db back into the aliased HBM buffer (in-place update).
        cp_out = pltpu.make_async_copy(db_vmem, db_out_ref, sem)
        cp_out.start()
        cp_out.wait()

    grid_spec = pltpu.PrefetchScalarGridSpec(
        num_scalar_prefetch=1,        # tgt indices live in SMEM
        grid=(1,),
        in_specs=[
            # gathered columns: tiny, full-array block in VMEM
            pl.BlockSpec((db_dim, n_writes), lambda i, tgt: (0, 0)),
            # db: left in HBM, kernel DMAs it itself (aliased with the output)
            pl.BlockSpec(memory_space=pl.ANY),
        ],
        out_specs=pl.BlockSpec(memory_space=pl.ANY),
        scratch_shapes=[
            pltpu.VMEM((db_dim, db_size), dtype),   # the single resident db copy
            pltpu.SemaphoreType.DMA,
        ],
    )
    return pl.pallas_call(
        kernel,
        grid_spec=grid_spec,
        out_shape=jax.ShapeDtypeStruct((db_dim, db_size), dtype),
        # Call operands are (tgt, cols, db) -- scalar-prefetch operands count,
        # so db is operand index 2; alias it to output 0 (in-place db update).
        input_output_aliases={2: 0},
        compiler_params=pltpu.CompilerParams(
            dimension_semantics=("arbitrary",)),
    )


class TensorAccumulator:
    """JAX/Pallas port of c3dm TensorAccumulator (training-mode forward only)."""

    def __init__(self, db_size=256, db_dim=3, perc_replace=0.01, seed=0):
        self.db_size = db_size
        self.db_dim = db_dim
        self.perc_replace = perc_replace
        # Matches the reference __init__: zeros of shape (db_dim, db_size).
        self.db = jnp.zeros((db_dim, db_size), jnp.float32)
        self.pointer = 0
        self.training = True
        self._rng = np.random.default_rng(seed)
        self._plans = []

    def reset(self):
        self.db = jnp.zeros((self.db_dim, self.db_size), jnp.float32)
        self.pointer = 0

    def get_db(self):
        return self.db

    def forward(self, embed, masks=None):
        if not self.training:
            return None
        ba = embed.shape[0]
        embed_flat = jnp.reshape(embed, (ba, self.db_dim, -1))
        n_pts = embed_flat.shape[-1]
        if masks is not None:
            mask_flat = np.asarray(masks).reshape(ba, -1)
        else:
            mask_flat = np.ones((ba, n_pts), np.float32)

        nsel_max = max(int(self.db_size * self.perc_replace), 1)
        src_idx = np.zeros((ba, nsel_max), np.int32)      # 0-padded (in bounds; masked out)
        tgt_idx = np.full((ba, nsel_max), -1, np.int32)   # -1 == "no write"

        # Host-side selection logic (the PyTorch module also runs this control
        # flow on the host: torch.nonzero + python `pointer` state + RNG).
        for bi in range(ba):
            sel = np.nonzero(mask_flat[bi])[0]
            if sel.size <= 2:
                continue
            if self.pointer >= self.db_size:
                nsel = nsel_max
                src = sel[self._rng.integers(0, sel.size, size=nsel)]
                tgt = self._rng.integers(0, self.db_size, size=nsel)
            else:
                nsel = min(nsel_max, self.db_size - self.pointer)
                src = sel[self._rng.integers(0, sel.size, size=nsel)]
                tgt = np.arange(self.pointer, self.pointer + nsel)
                self.pointer += nsel
            src_idx[bi, :nsel] = src.astype(np.int32)
            tgt_idx[bi, :nsel] = tgt.astype(np.int32)

        # Gather ONLY the selected columns (ba*nsel_max of them) with a tiny XLA
        # gather -- the Pallas kernel never sees / DMAs the full embed.
        src_dev = jnp.asarray(src_idx)                                           # (ba, nsel)
        gathered = jnp.take_along_axis(embed_flat, src_dev[:, None, :], axis=2)  # (ba, dim, nsel)
        cols = jnp.reshape(jnp.transpose(gathered, (1, 0, 2)),
                           (self.db_dim, ba * nsel_max)).astype(self.db.dtype)
        tgt_flat = jnp.asarray(tgt_idx.reshape(-1))                              # (ba*nsel,)

        call = _make_scatter_call(self.db_dim, self.db_size, ba * nsel_max,
                                  str(self.db.dtype))
        # db is updated in place (the operand is aliased to the output).
        self.db = call(tgt_flat, cols, self.db)

        self._plans.append((src_idx, tgt_idx))
        return None

    # TODO(synk): filter_db / density_filter / lap_filter / get_edm / get_nns are
    # offline db-maintenance utilities (not part of forward) and are not ported.


if __name__ == "__main__":
    key = jax.random.PRNGKey(0)
    k_e1, k_m1, k_e2, k_m2 = jax.random.split(key, 4)

    ba, db_dim, H, W = 2, 3, 16, 16
    db_size, perc_replace = 256, 0.01

    acc = TensorAccumulator(db_size=db_size, db_dim=db_dim,
                            perc_replace=perc_replace, seed=0)

    # Two forward passes: exercises the in-place (aliased) db update and that
    # previously written columns survive untouched.
    embeds = []
    for k_e, k_m in ((k_e1, k_m1), (k_e2, k_m2)):
        e = jax.random.normal(k_e, (ba, db_dim, H, W), jnp.float32)
        m = (jax.random.uniform(k_m, (ba, H, W)) > 0.5).astype(jnp.float32)
        embeds.append(e)
        acc.forward(e, m)

    new_db = np.asarray(jax.block_until_ready(acc.db))

    # Pure-numpy reference replaying the recorded scatter plans in write order.
    ref_db = np.zeros((db_dim, db_size), np.float32)
    total_writes = 0
    for e, (src_idx, tgt_idx) in zip(embeds, acc._plans):
        e_flat = np.asarray(e).reshape(ba, db_dim, -1)
        for bi in range(ba):
            for j in range(src_idx.shape[1]):
                t = int(tgt_idx[bi, j])
                if t >= 0:
                    ref_db[:, t] = e_flat[bi, :, int(src_idx[bi, j])]
                    total_writes += 1

    assert np.allclose(new_db, ref_db), "kernel result mismatch vs reference"
    assert acc.pointer == total_writes, "pointer update mismatch"
    print("KERNEL_OK")
</pallas_src>

<mosaic_0001>
module attributes {stable_mosaic.version = 11 : i64} {
  func.func @kernel(%arg0: i32, %arg1: memref<4xi32, #tpu.memory_space<smem>>, %arg2: memref<3x4xf32, #tpu.memory_space<vmem>>, %arg3: memref<3x256xf32, #tpu.memory_space<any>>, %arg4: memref<3x256xf32, #tpu.memory_space<any>>, %arg5: memref<3x256xf32, #tpu.memory_space<vmem>>, %arg6: memref<!tpu.dma_semaphore, #tpu.memory_space<semaphore_mem>>) attributes {dimension_semantics = [#tpu.dimension_semantics<arbitrary>], iteration_bounds = array<i64: 1>, scalar_prefetch = 1 : i64, scratch_operands = 2 : i64, tpu.core_type = #tpu.core_type<tc>, window_params = [{pipeline_mode = #tpu.pipeline_mode<synchronous>, transform_indices = @transform_0, window_bounds = array<i64: 3, 4>}, {}, {}]} {
    tpu.enqueue_dma source(%arg3 : memref<3x256xf32, #tpu.memory_space<any>>) target(%arg5 : memref<3x256xf32, #tpu.memory_space<vmem>>) target_semaphore(%arg6 : memref<!tpu.dma_semaphore, #tpu.memory_space<semaphore_mem>>)
    tpu.wait_dma2 semaphore(%arg6 : memref<!tpu.dma_semaphore, #tpu.memory_space<semaphore_mem>>) src(%arg3 : memref<3x256xf32, #tpu.memory_space<any>>) dst(%arg5 : memref<3x256xf32, #tpu.memory_space<vmem>>)
    %0 = tpu.iota {dimensions = array<i32: 1>} : vector<3x256xi32>
    %c0 = arith.constant 0 : index
    %c0_0 = arith.constant 0 : index
    %1 = vector.load %arg2[%c0, %c0_0] : memref<3x4xf32, #tpu.memory_space<vmem>>, vector<3x4xf32>
    %c0_1 = arith.constant 0 : index
    %c0_2 = arith.constant 0 : index
    %2 = vector.load %arg5[%c0_1, %c0_2] : memref<3x256xf32, #tpu.memory_space<vmem>>, vector<3x256xf32>
    %c0_3 = arith.constant 0 : index
    %3 = memref.load %arg1[%c0_3] : memref<4xi32, #tpu.memory_space<smem>>
    %4 = vector.broadcast %3 : i32 to vector<3x256xi32>
    %5 = arith.cmpi eq, %0, %4 : vector<3x256xi32>
    %6 = vector.extract_strided_slice %1 {offsets = [0, 0], sizes = [3, 1], strides = [1, 1]} : vector<3x4xf32> to vector<3x1xf32>
    %7 = vector.shape_cast %6 : vector<3x1xf32> to vector<3x1xf32>
    %8 = vector.broadcast %7 : vector<3x1xf32> to vector<3x256xf32>
    %9 = arith.select %5, %8, %2 : vector<3x256xi1>, vector<3x256xf32>
    %c1 = arith.constant 1 : index
    %10 = memref.load %arg1[%c1] : memref<4xi32, #tpu.memory_space<smem>>
    %11 = vector.broadcast %10 : i32 to vector<3x256xi32>
    %12 = arith.cmpi eq, %0, %11 : vector<3x256xi32>
    %13 = vector.extract_strided_slice %1 {offsets = [0, 1], sizes = [3, 1], strides = [1, 1]} : vector<3x4xf32> to vector<3x1xf32>
    %14 = vector.shape_cast %13 : vector<3x1xf32> to vector<3x1xf32>
    %15 = vector.broadcast %14 : vector<3x1xf32> to vector<3x256xf32>
    %16 = arith.select %12, %15, %9 : vector<3x256xi1>, vector<3x256xf32>
    %c2 = arith.constant 2 : index
    %17 = memref.load %arg1[%c2] : memref<4xi32, #tpu.memory_space<smem>>
    %18 = vector.broadcast %17 : i32 to vector<3x256xi32>
    %19 = arith.cmpi eq, %0, %18 : vector<3x256xi32>
    %20 = vector.extract_strided_slice %1 {offsets = [0, 2], sizes = [3, 1], strides = [1, 1]} : vector<3x4xf32> to vector<3x1xf32>
    %21 = vector.shape_cast %20 : vector<3x1xf32> to vector<3x1xf32>
    %22 = vector.broadcast %21 : vector<3x1xf32> to vector<3x256xf32>
    %23 = arith.select %19, %22, %16 : vector<3x256xi1>, vector<3x256xf32>
    %c3 = arith.constant 3 : index
    %24 = memref.load %arg1[%c3] : memref<4xi32, #tpu.memory_space<smem>>
    %25 = vector.broadcast %24 : i32 to vector<3x256xi32>
    %26 = arith.cmpi eq, %0, %25 : vector<3x256xi32>
    %27 = vector.extract_strided_slice %1 {offsets = [0, 3], sizes = [3, 1], strides = [1, 1]} : vector<3x4xf32> to vector<3x1xf32>
    %28 = vector.shape_cast %27 : vector<3x1xf32> to vector<3x1xf32>
    %29 = vector.broadcast %28 : vector<3x1xf32> to vector<3x256xf32>
    %30 = arith.select %26, %29, %23 : vector<3x256xi1>, vector<3x256xf32>
    %c0_4 = arith.constant 0 : index
    %c0_5 = arith.constant 0 : index
    %31 = vector.load %arg5[%c0_4, %c0_5] : memref<3x256xf32, #tpu.memory_space<vmem>>, vector<3x256xf32>
    tpu.vector_store %arg5[%c0_4, %c0_5], %30 {strides = array<i32>} : memref<3x256xf32, #tpu.memory_space<vmem>>, vector<3x256xf32>,
    tpu.enqueue_dma source(%arg5 : memref<3x256xf32, #tpu.memory_space<vmem>>) target(%arg4 : memref<3x256xf32, #tpu.memory_space<any>>) target_semaphore(%arg6 : memref<!tpu.dma_semaphore, #tpu.memory_space<semaphore_mem>>)
    tpu.wait_dma2 semaphore(%arg6 : memref<!tpu.dma_semaphore, #tpu.memory_space<semaphore_mem>>) src(%arg5 : memref<3x256xf32, #tpu.memory_space<vmem>>) dst(%arg4 : memref<3x256xf32, #tpu.memory_space<any>>)
    return
  }
  func.func @transform_0(%arg0: i32, %arg1: memref<4xi32, #tpu.memory_space<smem>>) -> (i32, i32) {
    %c0_i32 = arith.constant 0 : i32
    %c0_i32_0 = arith.constant 0 : i32
    %c0_i32_1 = arith.constant 0 : i32
    return %c0_i32, %c0_i32_0 : i32, i32
  }
}

</mosaic_0001>

<bundles_post_ra>
// kernel: tpu_custom_call.1
= control target key start
LH: loop header
LB: loop body
LE: loop exit
PB: predicated region body
PF: predicated region fallthrough
CT: control target
= control target key end

     0   :  { %s254_s0 = inlined_call_operand.vmem [shape: s32[4], index: 0, kind: input, shape index: {}]   ;;  %s255_s1 = inlined_call_operand.vmem [shape: f32[3,4], index: 1, kind: input, shape index: {}]   ;;  %s256_s2 = inlined_call_operand.hbm [shape: f32[3,256], index: 2, kind: input, shape index: {}, may-alias: {2,3}]   ;;  %s257_s3 = inlined_call_operand.hbm [shape: f32[3,256], index: 3, kind: output, shape index: {}, may-alias: {2,3}]  }
   0x1   :  { %s8_s14 = sshll.u32 %s254_s0, 4  ;;  %s9_s14 = int_to_ptr.vmem [resolvable:$true] %s8_s14 }
   0x2   :  { %s120_s15 = scalar_lea.vmem %s9_s14, 16  ;;  %p125_p1 = scmp.lt.s32.totalorder %s9_s14, %s9_s14 }
   0x3   :  { %p121_p0 = scmp.ne.s32.totalorder %s9_s14, %s120_s15  ;;  %p126_p2 = scmp.lt.s32.totalorder %s120_s15, %s120_s15 }
   0x5   :  { %p127_p3 = por %p126_p2, %p125_p1 }
   0x7   :  { %p128_p4 = pnand %p127_p3, %p121_p0 }
   0x9   :  { %131 = shalt.err (!%p128_p4)  }
   0xa   :  { %s182_s16 = smov [#allocation5]  }
   0xb   :  { %11 = dma.vmem_to_smem %s9_s14, 16, %s182_s16, [#allocation4] }
   0xc   :  { %176 = dma.done.wait [#allocation4], 16 }
   0xd   :  { %177 = vsyncadd [#allocation4], 4294967280 }
   0xe   :  { %13 = sfence }
   0xf   :  { %s183_s17 = smov [#allocation2]   ;;  %s132_s0 = scalar_lea.hbm %s256_s2, 128 }
  0x10   :  { %s23_s18 = sshll.u32 %s183_s17, 4  ;;  %p133_p5 = scmp.ne.s32.totalorder %s256_s2, %s132_s0  ;;  %s211_s18 = int_to_ptr.vmem [resolvable:$true] %s23_s18 }
  0x11   :  { %p136_p6 = scmp.lt.u32.totalorder %s132_s0, %s256_s2 }
  0x13   :  { %p138_p7 = pnand %p136_p6, %p133_p5 }
  0x15   :  { %141 = shalt.err (!%p138_p7)  }
  0x16   :  { %s142_s25 = scalar_lea.vmem %s211_s18, 128  ;;  %p147_p9 = scmp.lt.s32.totalorder %s211_s18, %s211_s18 }
  0x17   :  { %p143_p8 = scmp.ne.s32.totalorder %s211_s18, %s142_s25  ;;  %p148_p10 = scmp.lt.s32.totalorder %s142_s25, %s142_s25 }
  0x19   :  { %p149_p11 = por %p148_p10, %p147_p9 }
  0x1b   :  { %p226_p12 = pnand %p149_p11, %p143_p8 }
  0x1d   :  { %153 = shalt.err (!%p226_p12)  }
  0x1e   :  { %26 = dma.hbm_to_vmem [thread:$0]  %s256_s2, 128, %s211_s18, [#allocation3] }
  0x1f   :  { %178 = dma.done.wait [#allocation3], 128 }
  0x20   :  { %179 = vsyncadd [#allocation3], 4294967168  ;;  %v184_v0 = vmov 0   ;;  %v185_v1 = vmov 2   ;;  %v34_v2 = vld [vmem:[%s255_s1] sm:$0x7]  ;;  %v31_v5 = vlaneseq }
  0x21   :  { %114 = vset.pattern.permute.xlu0 %v184_v0  ;;  %116 = vset.pattern.permute.xlu1 %v185_v1  ;;  %v186_v3 = vmov 1   ;;  %v187_v4 = vmov 3   ;;  %s36_s2 = sld [smem:[#allocation5]]  ;;  %s104_s4 = sld [smem:[#allocation5 + $0x1]]  ;;  %v35_v8 = vld [vmem:[#allocation2] sm:$0x77] }
  0x22   :  { %42 = vperm.xlu0 %114, %v34_v2   ;;  %65 = vperm.xlu1 %116, %v34_v2   ;;  %s105_s5 = sld [smem:[#allocation5 + $0x2]]  ;;  %v32_v6 = vand.u32 127, %v31_v5  ;;  %s106_s6 = sld [smem:[#allocation5 + $0x3]]  ;;  %v46_v13 = vcombine.high %v35_v8, %v35_v8 }
  0x24   :  { %v33_v7 = vadd.s32 128, %v32_v6 }
  0x26   :  { %115 = vset.pattern.permute.xlu0 %v186_v3  ;;  %117 = vset.pattern.permute.xlu1 %v187_v4 }
  0x27   :  { %55 = vperm.xlu0 %115, %v34_v2   ;;  %75 = vperm.xlu1 %117, %v34_v2   ;;  %v37_v9 = vstv %s36_s2  ;;  %v51_v12 = vstv %s104_s4 }
  0x28   :  { %v61_v14 = vstv %s105_s5  ;;  %vm38_vm0 = vcmp.eq.s32.totalorder %v32_v6, %v37_v9  ;;  %vm39_vm1 = vcmp.eq.s32.totalorder %v33_v7, %v37_v9  ;;  %v71_v15 = vstv %s106_s6 }
  0x29   :  { %vm52_vm2 = vcmp.eq.s32.totalorder %v32_v6, %v51_v12  ;;  %vm53_vm3 = vcmp.eq.s32.totalorder %v33_v7, %v51_v12  ;;  %vm62_vm4 = vcmp.eq.s32.totalorder %v32_v6, %v61_v14  ;;  %vm63_vm5 = vcmp.eq.s32.totalorder %v33_v7, %v61_v14 }
  0x2a   :  { %vm72_vm6 = vcmp.eq.s32.totalorder %v32_v6, %v71_v15  ;;  %vm73_vm7 = vcmp.eq.s32.totalorder %v33_v7, %v71_v15 }
  0x2b   :  { %118 = vset.pattern.permute.xlu0 %v187_v4 }
  0xa1   :  { %v43_v10 = vpop.permute.xlu0 %42  ;;  %v66_v11 = vpop.permute.xlu1 %65 }
  0xa2   :  { %v48_v16 = vsel %vm38_vm0, %v43_v10, %v35_v8  ;;  %v49_v17 = vsel %vm39_vm1, %v43_v10, %v46_v13 }
  0xa6   :  { %v56_v18 = vpop.permute.xlu0 %55  ;;  %v76_v19 = vpop.permute.xlu1 %75 }
  0xa7   :  { %v58_v20 = vsel %vm52_vm2, %v56_v18, %v48_v16  ;;  %v59_v21 = vsel %vm53_vm3, %v56_v18, %v49_v17 }
  0xa8   :  { %v68_v22 = vsel %vm62_vm4, %v66_v11, %v58_v20  ;;  %v69_v23 = vsel %vm63_vm5, %v66_v11, %v59_v21 }
  0xa9   :  { %v78_v24 = vsel %vm72_vm6, %v76_v19, %v68_v22  ;;  %v79_v25 = vsel %vm73_vm7, %v76_v19, %v69_v23 }
  0xaa   :  { %v82_v26 = vcombine.low %v78_v24, %v79_v25 }
  0xac   :  { %84 = vst [vmem:[#allocation2] sm:$0x77] %v82_v26 }
  0xad   :  { %165 = shalt.err (!%p226_p12)  }
  0xae   :  { %s166_s8 = scalar_lea.hbm %s257_s3, 128 }
  0xaf   :  { %p167_p13 = scmp.ne.s32.totalorder %s257_s3, %s166_s8  ;;  %p170_p0 = scmp.lt.u32.totalorder %s166_s8, %s257_s3 }
  0xb1   :  { %p172_p1 = pnand %p170_p0, %p167_p13 }
  0xb3   :  { %175 = shalt.err (!%p172_p1)  }
  0xb4   :  { %95 = dma.vmem_to_hbm [thread:$0]  %s211_s18, 128, %s257_s3, [#allocation3] }
  0xb5   :  { %180 = dma.done.wait [#allocation3], 128 }
  0xb6   :  { %181 = vsyncadd [#allocation3], 4294967168 }
  0xb7   :  { %98 = vsyncmov [#allocation3] }
  0xba   :  { %s99_s15 = vpop.sfrf %98 }
  0xbb   :  { %p107_p2 = scmp.ne.s32.totalorder %s99_s15, 0 }
  0xbd   :  { %103 = shalt.err (%p107_p2)  }

</bundles_post_ra>
